<compile_context>
chip_gen: v7x
topology: tpu7x:2x2x1
jax: 0.10.0
libtpu: 0.0.40
codegen_flags: <defaults>
</compile_context>

<pallas_src>
import functools

import jax
import jax.numpy as jnp
from jax import lax
from jax.experimental import pallas as pl
from jax.experimental.pallas import tpu as pltpu


def ds_kernel(xpad_ref, dw_ref, bn1b_ref, sew1_ref, seb1_ref,
              sew2_ref, seb2_ref, pw_ref, bn2b_ref, o_ref,
              *, W, HW, PL, has_residual):
    """One grid step == one batch element.

    xpad_ref : (C, PL + HW + PR)  halo-padded, H*W flattened onto lanes
    dw_ref   : (C, 9)             depthwise taps (bn1 scale folded in)
    pw_ref   : (Cout, C)          pointwise weights (bn2 scale folded in)
    o_ref    : (Cout, HW)
    """

    def tap(dy, dx):
        # out[c, h*W+w] += x[c, (h+dy)*W + (w+dx)] * dw[c, (dy+1)*3+(dx+1)]
        off = PL + dy * W + dx                         # static lane shift
        k = (dy + 1) * 3 + (dx + 1)
        return xpad_ref[:, off:off + HW] * dw_ref[:, k:k + 1]   # (C, HW)

    # --- depthwise 3x3, stride 1, pad 1 ---------------------------------------
    # dx = 0 column: always valid, accumulate directly (no mask, no extra add).
    acc = tap(-1, 0) + tap(0, 0) + tap(1, 0)
    # dx = -1 / +1 columns: kill the column wrap-around with a per-lane mask
    # built from an iota (row wraps land in the zero halo automatically).
    left = tap(-1, -1) + tap(0, -1) + tap(1, -1)
    right = tap(-1, 1) + tap(0, 1) + tap(1, 1)
    col = lax.broadcasted_iota(jnp.int32, (1, HW), 1) % W
    acc = acc + jnp.where(col != 0, left, 0.0) + jnp.where(col != W - 1, right, 0.0)

    # --- bn1 bias (scale already folded into dw) + Swish ----------------------
    y = acc + bn1b_ref[...]
    y = y * jax.nn.sigmoid(y)

    # --- SqueezeExcite: avgpool -> reduce FC -> Swish -> expand FC -> gate ----
    # Tiny FCs stay on the VPU/XLU/EUP (M=1 matmuls are not worth the MXU).
    pooled = jnp.mean(y, axis=1, keepdims=True)                               # (C, 1)
    s = jnp.sum(pooled * sew1_ref[...], axis=0, keepdims=True) + seb1_ref[...]  # (1, SE)
    s = s * jax.nn.sigmoid(s)
    g = jnp.sum(s * sew2_ref[...], axis=1, keepdims=True) + seb2_ref[...]       # (C, 1)
    y = y * jax.nn.sigmoid(g)

    # --- pointwise 1x1 (MXU) + bn2 bias + optional residual -------------------
    ob = jnp.dot(pw_ref[...], y, preferred_element_type=jnp.float32)            # (Cout, HW)
    ob = ob + bn2b_ref[...]
    if has_residual:
        ob = ob + xpad_ref[:, PL:PL + HW]            # lane-aligned interior read
    o_ref[...] = ob.astype(o_ref.dtype)


def ds_conv_pallas(x_nchw, p, has_residual=True):
    """x_nchw: (B, C, H, W) float32 -> (B, Cout, H, W) float32."""
    B, C, H, W = x_nchw.shape
    HW = H * W
    PL = 128                       # lane-aligned left halo (center tap + residual)
    PR = 128                       # >= W+1, rounded so the padded slab is lane-dense
    HWp = PL + HW + PR
    Cout = p["pw"].shape[0]
    SE = p["sew1"].shape[1]

    # Flatten H,W onto lanes + zero halo; every 3x3 tap is a static lane shift.
    xpad = jnp.pad(x_nchw.reshape(B, C, HW), ((0, 0), (0, 0), (PL, PR)))

    # Fold BN scales into the (linear) conv weights; only biases enter the kernel.
    dw9 = jnp.transpose(p["dw"].reshape(9, C)) * p["bn1s"]     # (C, 9)
    pw2 = p["pw"] * p["bn2s"]                                  # (Cout, C)
    sew2t = p["sew2"].T                                        # (C, SE)
    seb2c = p["seb2"].reshape(-1, 1)                           # (C, 1)

    kernel = functools.partial(
        ds_kernel, W=W, HW=HW, PL=PL,
        has_residual=bool(has_residual and C == Cout))

    def fixed(shape):
        zeros = (0,) * len(shape)
        return pl.BlockSpec(shape, lambda b: zeros)            # same block every step

    out_flat = pl.pallas_call(
        kernel,
        out_shape=jax.ShapeDtypeStruct((B, Cout, HW), x_nchw.dtype),
        grid=(B,),
        in_specs=[
            pl.BlockSpec((pl.Squeezed(), C, HWp), lambda b: (b, 0, 0)),
            fixed((C, 9)),        # dw (bn1 scale folded)
            fixed((C, 1)),        # bn1 bias
            fixed((C, SE)),       # SE reduce weight
            fixed((1, SE)),       # SE reduce bias
            fixed((C, SE)),       # SE expand weight (transposed)
            fixed((C, 1)),        # SE expand bias
            fixed((Cout, C)),     # pw (bn2 scale folded)
            fixed((Cout, 1)),     # bn2 bias
        ],
        out_specs=pl.BlockSpec((pl.Squeezed(), Cout, HW), lambda b: (b, 0, 0)),
        compiler_params=pltpu.CompilerParams(
            dimension_semantics=("parallel",)),
    )(xpad, dw9, p["bn1b"], p["sew1"], p["seb1"], sew2t, seb2c, pw2, p["bn2b"])

    return out_flat.reshape(B, Cout, H, W)                     # free reshape


def ds_conv_ref(x, p, has_residual=True):
    """Pure-JAX reference in NCHW (same math, lax.conv for the depthwise part)."""
    B, C, H, W = x.shape
    dw_oihw = jnp.transpose(p["dw"], (2, 0, 1))[:, None, :, :]  # (C, 1, 3, 3)
    y = lax.conv_general_dilated(
        x, dw_oihw, window_strides=(1, 1), padding="SAME",
        dimension_numbers=("NCHW", "OIHW", "NCHW"), feature_group_count=C)
    y = y * p["bn1s"].reshape(1, C, 1, 1) + p["bn1b"].reshape(1, C, 1, 1)
    y = y * jax.nn.sigmoid(y)
    pooled = jnp.mean(y, axis=(2, 3))                           # (B, C)
    s = pooled @ p["sew1"] + p["seb1"]
    s = s * jax.nn.sigmoid(s)
    g = jax.nn.sigmoid(s @ p["sew2"] + p["seb2"])               # (B, C)
    y = y * g[:, :, None, None]
    out = jnp.einsum("oc,bchw->bohw", p["pw"], y)
    out = out * p["bn2s"].reshape(1, -1, 1, 1) + p["bn2b"].reshape(1, -1, 1, 1)
    if has_residual and p["pw"].shape[0] == C:
        out = out + x
    return out


def make_params(key, C=16, SE=8, OUT=16, eps=1e-5):
    ks = jax.random.split(key, 16)

    def bn_fused(kg, kb, km, kv, ch):
        gamma = 1.0 + 0.1 * jax.random.normal(kg, (ch,), jnp.float32)
        beta = 0.1 * jax.random.normal(kb, (ch,), jnp.float32)
        mean = 0.1 * jax.random.normal(km, (ch,), jnp.float32)
        var = jax.nn.softplus(jax.random.normal(kv, (ch,), jnp.float32)) + 0.5
        scale = gamma / jnp.sqrt(var + eps)
        bias = beta - mean * scale
        return scale.reshape(ch, 1), bias.reshape(ch, 1)

    bn1s, bn1b = bn_fused(ks[1], ks[2], ks[3], ks[4], C)
    bn2s, bn2b = bn_fused(ks[10], ks[11], ks[12], ks[13], OUT)
    return {
        # depthwise taps stored (kh, kw, C); torch layout is (C, 1, kh, kw)
        "dw": 0.2 * jax.random.normal(ks[0], (3, 3, C), jnp.float32),
        "bn1s": bn1s, "bn1b": bn1b,
        # SE weights stored (in, out); torch conv layouts are (out, in, 1, 1)
        "sew1": 0.2 * jax.random.normal(ks[5], (C, SE), jnp.float32),
        "seb1": 0.1 * jax.random.normal(ks[6], (1, SE), jnp.float32),
        "sew2": 0.2 * jax.random.normal(ks[7], (SE, C), jnp.float32),
        "seb2": 0.1 * jax.random.normal(ks[8], (1, C), jnp.float32),
        # pointwise weights stored (Cout, Cin); torch layout is (Cout, Cin, 1, 1)
        "pw": 0.2 * jax.random.normal(ks[9], (OUT, C), jnp.float32),
        "bn2s": bn2s, "bn2b": bn2b,
    }


if __name__ == "__main__":
    B, C, H, W = 2, 16, 16, 16            # module defaults: in=dw=out=16, se=8
    key = jax.random.PRNGKey(0)
    kx, kp = jax.random.split(key)
    x = jax.random.normal(kx, (B, C, H, W), jnp.float32)
    params = make_params(kp, C=C, SE=8, OUT=C)

    out = jax.block_until_ready(jax.jit(ds_conv_pallas)(x, params))
    ref = jax.block_until_ready(ds_conv_ref(x, params))

    assert out.shape == (B, C, H, W)
    assert jnp.allclose(out, ref, atol=1e-3, rtol=1e-3), "mismatch vs JAX reference"

    print("KERNEL_OK")
</pallas_src>

<mosaic_0001>
module attributes {stable_mosaic.version = 11 : i64} {
  func.func @ds_kernel(%arg0: i32, %arg1: memref<1x16x512xf32, #tpu.memory_space<vmem>>, %arg2: memref<16x9xf32, #tpu.memory_space<vmem>>, %arg3: memref<16x1xf32, #tpu.memory_space<vmem>>, %arg4: memref<16x8xf32, #tpu.memory_space<vmem>>, %arg5: memref<1x8xf32, #tpu.memory_space<vmem>>, %arg6: memref<16x8xf32, #tpu.memory_space<vmem>>, %arg7: memref<16x1xf32, #tpu.memory_space<vmem>>, %arg8: memref<16x16xf32, #tpu.memory_space<vmem>>, %arg9: memref<16x1xf32, #tpu.memory_space<vmem>>, %arg10: memref<1x16x256xf32, #tpu.memory_space<vmem>>) attributes {dimension_semantics = [#tpu.dimension_semantics<parallel>], iteration_bounds = array<i64: 2>, scalar_prefetch = 0 : i64, scratch_operands = 0 : i64, tpu.core_type = #tpu.core_type<tc>, window_params = [{transform_indices = @transform_0, window_bounds = array<i64: 1, 16, 512>}, {pipeline_mode = #tpu.pipeline_mode<synchronous>, transform_indices = @transform_1, window_bounds = array<i64: 16, 9>}, {pipeline_mode = #tpu.pipeline_mode<synchronous>, transform_indices = @transform_2, window_bounds = array<i64: 16, 1>}, {pipeline_mode = #tpu.pipeline_mode<synchronous>, transform_indices = @transform_3, window_bounds = array<i64: 16, 8>}, {pipeline_mode = #tpu.pipeline_mode<synchronous>, transform_indices = @transform_4, window_bounds = array<i64: 1, 8>}, {pipeline_mode = #tpu.pipeline_mode<synchronous>, transform_indices = @transform_5, window_bounds = array<i64: 16, 8>}, {pipeline_mode = #tpu.pipeline_mode<synchronous>, transform_indices = @transform_6, window_bounds = array<i64: 16, 1>}, {pipeline_mode = #tpu.pipeline_mode<synchronous>, transform_indices = @transform_7, window_bounds = array<i64: 16, 16>}, {pipeline_mode = #tpu.pipeline_mode<synchronous>, transform_indices = @transform_8, window_bounds = array<i64: 16, 1>}, {transform_indices = @transform_9, window_bounds = array<i64: 1, 16, 256>}]} {
    %c0 = arith.constant 0 : index
    %c0_0 = arith.constant 0 : index
    %c112 = arith.constant 112 : index
    %0 = vector.load %arg1[%c0, %c0_0, %c112] : memref<1x16x512xf32, #tpu.memory_space<vmem>>, vector<1x16x256xf32>
    %1 = vector.shape_cast %0 : vector<1x16x256xf32> to vector<16x256xf32>
    %c0_1 = arith.constant 0 : index
    %c1 = arith.constant 1 : index
    %2 = vector.load %arg2[%c0_1, %c1] : memref<16x9xf32, #tpu.memory_space<vmem>>, vector<16x1xf32>
    %3 = vector.broadcast %2 : vector<16x1xf32> to vector<16x256xf32>
    %4 = arith.mulf %1, %3 : vector<16x256xf32>
    %c0_2 = arith.constant 0 : index
    %c0_3 = arith.constant 0 : index
    %c128 = arith.constant 128 : index
    %5 = vector.load %arg1[%c0_2, %c0_3, %c128] : memref<1x16x512xf32, #tpu.memory_space<vmem>>, vector<1x16x256xf32>
    %6 = vector.shape_cast %5 : vector<1x16x256xf32> to vector<16x256xf32>
    %c0_4 = arith.constant 0 : index
    %c4 = arith.constant 4 : index
    %7 = vector.load %arg2[%c0_4, %c4] : memref<16x9xf32, #tpu.memory_space<vmem>>, vector<16x1xf32>
    %8 = vector.broadcast %7 : vector<16x1xf32> to vector<16x256xf32>
    %9 = arith.mulf %6, %8 : vector<16x256xf32>
    %10 = arith.addf %4, %9 : vector<16x256xf32>
    %c0_5 = arith.constant 0 : index
    %c0_6 = arith.constant 0 : index
    %c144 = arith.constant 144 : index
    %11 = vector.load %arg1[%c0_5, %c0_6, %c144] : memref<1x16x512xf32, #tpu.memory_space<vmem>>, vector<1x16x256xf32>
    %12 = vector.shape_cast %11 : vector<1x16x256xf32> to vector<16x256xf32>
    %c0_7 = arith.constant 0 : index
    %c7 = arith.constant 7 : index
    %13 = vector.load %arg2[%c0_7, %c7] : memref<16x9xf32, #tpu.memory_space<vmem>>, vector<16x1xf32>
    %14 = vector.broadcast %13 : vector<16x1xf32> to vector<16x256xf32>
    %15 = arith.mulf %12, %14 : vector<16x256xf32>
    %16 = arith.addf %10, %15 : vector<16x256xf32>
    %c0_8 = arith.constant 0 : index
    %c0_9 = arith.constant 0 : index
    %c111 = arith.constant 111 : index
    %17 = vector.load %arg1[%c0_8, %c0_9, %c111] : memref<1x16x512xf32, #tpu.memory_space<vmem>>, vector<1x16x256xf32>
    %18 = vector.shape_cast %17 : vector<1x16x256xf32> to vector<16x256xf32>
    %c0_10 = arith.constant 0 : index
    %c0_11 = arith.constant 0 : index
    %19 = vector.load %arg2[%c0_10, %c0_11] : memref<16x9xf32, #tpu.memory_space<vmem>>, vector<16x1xf32>
    %20 = vector.broadcast %19 : vector<16x1xf32> to vector<16x256xf32>
    %21 = arith.mulf %18, %20 : vector<16x256xf32>
    %c0_12 = arith.constant 0 : index
    %c0_13 = arith.constant 0 : index
    %c127 = arith.constant 127 : index
    %22 = vector.load %arg1[%c0_12, %c0_13, %c127] : memref<1x16x512xf32, #tpu.memory_space<vmem>>, vector<1x16x256xf32>
    %23 = vector.shape_cast %22 : vector<1x16x256xf32> to vector<16x256xf32>
    %c0_14 = arith.constant 0 : index
    %c3 = arith.constant 3 : index
    %24 = vector.load %arg2[%c0_14, %c3] : memref<16x9xf32, #tpu.memory_space<vmem>>, vector<16x1xf32>
    %25 = vector.broadcast %24 : vector<16x1xf32> to vector<16x256xf32>
    %26 = arith.mulf %23, %25 : vector<16x256xf32>
    %27 = arith.addf %21, %26 : vector<16x256xf32>
    %c0_15 = arith.constant 0 : index
    %c0_16 = arith.constant 0 : index
    %c143 = arith.constant 143 : index
    %28 = vector.load %arg1[%c0_15, %c0_16, %c143] : memref<1x16x512xf32, #tpu.memory_space<vmem>>, vector<1x16x256xf32>
    %29 = vector.shape_cast %28 : vector<1x16x256xf32> to vector<16x256xf32>
    %c0_17 = arith.constant 0 : index
    %c6 = arith.constant 6 : index
    %30 = vector.load %arg2[%c0_17, %c6] : memref<16x9xf32, #tpu.memory_space<vmem>>, vector<16x1xf32>
    %31 = vector.broadcast %30 : vector<16x1xf32> to vector<16x256xf32>
    %32 = arith.mulf %29, %31 : vector<16x256xf32>
    %33 = arith.addf %27, %32 : vector<16x256xf32>
    %c0_18 = arith.constant 0 : index
    %c0_19 = arith.constant 0 : index
    %c113 = arith.constant 113 : index
    %34 = vector.load %arg1[%c0_18, %c0_19, %c113] : memref<1x16x512xf32, #tpu.memory_space<vmem>>, vector<1x16x256xf32>
    %35 = vector.shape_cast %34 : vector<1x16x256xf32> to vector<16x256xf32>
    %c0_20 = arith.constant 0 : index
    %c2 = arith.constant 2 : index
    %36 = vector.load %arg2[%c0_20, %c2] : memref<16x9xf32, #tpu.memory_space<vmem>>, vector<16x1xf32>
    %37 = vector.broadcast %36 : vector<16x1xf32> to vector<16x256xf32>
    %38 = arith.mulf %35, %37 : vector<16x256xf32>
    %c0_21 = arith.constant 0 : index
    %c0_22 = arith.constant 0 : index
    %c129 = arith.constant 129 : index
    %39 = vector.load %arg1[%c0_21, %c0_22, %c129] : memref<1x16x512xf32, #tpu.memory_space<vmem>>, vector<1x16x256xf32>
    %40 = vector.shape_cast %39 : vector<1x16x256xf32> to vector<16x256xf32>
    %c0_23 = arith.constant 0 : index
    %c5 = arith.constant 5 : index
    %41 = vector.load %arg2[%c0_23, %c5] : memref<16x9xf32, #tpu.memory_space<vmem>>, vector<16x1xf32>
    %42 = vector.broadcast %41 : vector<16x1xf32> to vector<16x256xf32>
    %43 = arith.mulf %40, %42 : vector<16x256xf32>
    %44 = arith.addf %38, %43 : vector<16x256xf32>
    %c0_24 = arith.constant 0 : index
    %c0_25 = arith.constant 0 : index
    %c145 = arith.constant 145 : index
    %45 = vector.load %arg1[%c0_24, %c0_25, %c145] : memref<1x16x512xf32, #tpu.memory_space<vmem>>, vector<1x16x256xf32>
    %46 = vector.shape_cast %45 : vector<1x16x256xf32> to vector<16x256xf32>
    %c0_26 = arith.constant 0 : index
    %c8 = arith.constant 8 : index
    %47 = vector.load %arg2[%c0_26, %c8] : memref<16x9xf32, #tpu.memory_space<vmem>>, vector<16x1xf32>
    %48 = vector.broadcast %47 : vector<16x1xf32> to vector<16x256xf32>
    %49 = arith.mulf %46, %48 : vector<16x256xf32>
    %50 = arith.addf %44, %49 : vector<16x256xf32>
    %51 = tpu.iota {dimensions = array<i32: 1>} : vector<1x256xi32>
    %c16_i32 = arith.constant 16 : i32
    %c0_i32 = arith.constant 0 : i32
    %52 = arith.cmpi eq, %c16_i32, %c0_i32 : i32
    %c1_i32 = arith.constant 1 : i32
    %53 = arith.select %52, %c1_i32, %c16_i32 : i32
    %54 = vector.broadcast %53 : i32 to vector<1x256xi32>
    %55 = arith.remsi %51, %54 : vector<1x256xi32>
    %c0_i32_27 = arith.constant 0 : i32
    %56 = vector.broadcast %c0_i32_27 : i32 to vector<1x256xi32>
    %57 = arith.cmpi ne, %55, %56 : vector<1x256xi32>
    %c0_i32_28 = arith.constant 0 : i32
    %58 = vector.broadcast %c0_i32_28 : i32 to vector<1x256xi32>
    %59 = arith.cmpi slt, %55, %58 : vector<1x256xi32>
    %c0_i32_29 = arith.constant 0 : i32
    %60 = arith.cmpi slt, %53, %c0_i32_29 : i32
    %61 = vector.broadcast %60 : i1 to vector<1x256xi1>
    %62 = vector.broadcast %61 : vector<1x256xi1> to vector<1x256xi1>
    %63 = arith.xori %59, %62 : vector<1x256xi1>
    %64 = arith.andi %63, %57 : vector<1x256xi1>
    %65 = vector.broadcast %53 : i32 to vector<1x256xi32>
    %66 = arith.addi %55, %65 : vector<1x256xi32>
    %67 = arith.select %64, %66, %55 : vector<1x256xi1>, vector<1x256xi32>
    %c0_i32_30 = arith.constant 0 : i32
    %68 = vector.broadcast %c0_i32_30 : i32 to vector<1x256xi32>
    %69 = arith.cmpi ne, %67, %68 : vector<1x256xi32>
    %cst = arith.constant 0.000000e+00 : f32
    %70 = vector.shape_cast %69 : vector<1x256xi1> to vector<1x256xi1>
    %71 = vector.broadcast %70 : vector<1x256xi1> to vector<16x256xi1>
    %72 = vector.broadcast %cst : f32 to vector<16x256xf32>
    %73 = arith.select %71, %33, %72 : vector<16x256xi1>, vector<16x256xf32>
    %74 = arith.addf %16, %73 : vector<16x256xf32>
    %c15_i32 = arith.constant 15 : i32
    %75 = vector.broadcast %c15_i32 : i32 to vector<1x256xi32>
    %76 = arith.cmpi ne, %67, %75 : vector<1x256xi32>
    %cst_31 = arith.constant 0.000000e+00 : f32
    %77 = vector.shape_cast %76 : vector<1x256xi1> to vector<1x256xi1>
    %78 = vector.broadcast %77 : vector<1x256xi1> to vector<16x256xi1>
    %79 = vector.broadcast %cst_31 : f32 to vector<16x256xf32>
    %80 = arith.select %78, %50, %79 : vector<16x256xi1>, vector<16x256xf32>
    %81 = arith.addf %74, %80 : vector<16x256xf32>
    %c0_32 = arith.constant 0 : index
    %c0_33 = arith.constant 0 : index
    %82 = vector.load %arg3[%c0_32, %c0_33] : memref<16x1xf32, #tpu.memory_space<vmem>>, vector<16x1xf32>
    %83 = vector.broadcast %82 : vector<16x1xf32> to vector<16x256xf32>
    %84 = arith.addf %81, %83 : vector<16x256xf32>
    %85 = arith.negf %84 : vector<16x256xf32>
    %86 = math.exp %85 : vector<16x256xf32>
    %cst_34 = arith.constant 1.000000e+00 : f32
    %87 = vector.broadcast %cst_34 : f32 to vector<16x256xf32>
    %88 = arith.addf %87, %86 : vector<16x256xf32>
    %89 = arith.divf %87, %88 : vector<16x256xf32>
    %90 = arith.mulf %84, %89 : vector<16x256xf32>
    %cst_35 = arith.constant dense<0.000000e+00> : vector<16xf32>
    %91 = vector.multi_reduction <add>, %90, %cst_35 [1] : vector<16x256xf32> to vector<16xf32>
    %92 = vector.shape_cast %91 : vector<16xf32> to vector<16x1xf32>
    %cst_36 = arith.constant 2.560000e+02 : f32
    %93 = vector.broadcast %cst_36 : f32 to vector<16x1xf32>
    %94 = arith.divf %92, %93 : vector<16x1xf32>
    %c0_37 = arith.constant 0 : index
    %c0_38 = arith.constant 0 : index
    %95 = vector.load %arg4[%c0_37, %c0_38] : memref<16x8xf32, #tpu.memory_space<vmem>>, vector<16x8xf32>
    %96 = vector.broadcast %94 : vector<16x1xf32> to vector<16x8xf32>
    %97 = arith.mulf %96, %95 : vector<16x8xf32>
    %cst_39 = arith.constant dense<0.000000e+00> : vector<8xf32>
    %98 = vector.multi_reduction <add>, %97, %cst_39 [0] : vector<16x8xf32> to vector<8xf32>
    %99 = vector.shape_cast %98 : vector<8xf32> to vector<1x8xf32>
    %c0_40 = arith.constant 0 : index
    %c0_41 = arith.constant 0 : index
    %100 = vector.load %arg5[%c0_40, %c0_41] : memref<1x8xf32, #tpu.memory_space<vmem>>, vector<1x8xf32>
    %101 = arith.addf %99, %100 : vector<1x8xf32>
    %102 = arith.negf %101 : vector<1x8xf32>
    %103 = math.exp %102 : vector<1x8xf32>
    %cst_42 = arith.constant 1.000000e+00 : f32
    %104 = vector.broadcast %cst_42 : f32 to vector<1x8xf32>
    %105 = arith.addf %104, %103 : vector<1x8xf32>
    %106 = arith.divf %104, %105 : vector<1x8xf32>
    %107 = arith.mulf %101, %106 : vector<1x8xf32>
    %c0_43 = arith.constant 0 : index
    %c0_44 = arith.constant 0 : index
    %108 = vector.load %arg6[%c0_43, %c0_44] : memref<16x8xf32, #tpu.memory_space<vmem>>, vector<16x8xf32>
    %109 = vector.broadcast %107 : vector<1x8xf32> to vector<16x8xf32>
    %110 = arith.mulf %109, %108 : vector<16x8xf32>
    %cst_45 = arith.constant dense<0.000000e+00> : vector<16xf32>
    %111 = vector.multi_reduction <add>, %110, %cst_45 [1] : vector<16x8xf32> to vector<16xf32>
    %112 = vector.shape_cast %111 : vector<16xf32> to vector<16x1xf32>
    %c0_46 = arith.constant 0 : index
    %c0_47 = arith.constant 0 : index
    %113 = vector.load %arg7[%c0_46, %c0_47] : memref<16x1xf32, #tpu.memory_space<vmem>>, vector<16x1xf32>
    %114 = arith.addf %112, %113 : vector<16x1xf32>
    %115 = arith.negf %114 : vector<16x1xf32>
    %116 = math.exp %115 : vector<16x1xf32>
    %cst_48 = arith.constant 1.000000e+00 : f32
    %117 = vector.broadcast %cst_48 : f32 to vector<16x1xf32>
    %118 = arith.addf %117, %116 : vector<16x1xf32>
    %119 = arith.divf %117, %118 : vector<16x1xf32>
    %120 = vector.broadcast %119 : vector<16x1xf32> to vector<16x256xf32>
    %121 = arith.mulf %90, %120 : vector<16x256xf32>
    %c0_49 = arith.constant 0 : index
    %c0_50 = arith.constant 0 : index
    %122 = vector.load %arg8[%c0_49, %c0_50] : memref<16x16xf32, #tpu.memory_space<vmem>>, vector<16x16xf32>
    %cst_51 = arith.constant dense<0.000000e+00> : vector<16x256xf32>
    %123 = tpu.matmul %122, %121, %cst_51 {dimension_numbers = #tpu.dot_dimension_numbers<[1], [0], [0], [1], [0, 0, 1, 1], [], []>} : vector<16x16xf32>, vector<16x256xf32>, vector<16x256xf32> -> vector<16x256xf32>
    %c0_52 = arith.constant 0 : index
    %c0_53 = arith.constant 0 : index
    %124 = vector.load %arg9[%c0_52, %c0_53] : memref<16x1xf32, #tpu.memory_space<vmem>>, vector<16x1xf32>
    %125 = vector.broadcast %124 : vector<16x1xf32> to vector<16x256xf32>
    %126 = arith.addf %123, %125 : vector<16x256xf32>
    %c0_54 = arith.constant 0 : index
    %c0_55 = arith.constant 0 : index
    %c128_56 = arith.constant 128 : index
    %127 = vector.load %arg1[%c0_54, %c0_55, %c128_56] : memref<1x16x512xf32, #tpu.memory_space<vmem>>, vector<1x16x256xf32>
    %128 = vector.shape_cast %127 : vector<1x16x256xf32> to vector<16x256xf32>
    %129 = arith.addf %126, %128 : vector<16x256xf32>
    %c0_57 = arith.constant 0 : index
    %c0_58 = arith.constant 0 : index
    %c0_59 = arith.constant 0 : index
    %130 = vector.load %arg10[%c0_57, %c0_58, %c0_59] : memref<1x16x256xf32, #tpu.memory_space<vmem>>, vector<1x16x256xf32>
    %131 = vector.shape_cast %130 : vector<1x16x256xf32> to vector<16x256xf32>
    %132 = vector.shape_cast %129 : vector<16x256xf32> to vector<1x16x256xf32>
    tpu.vector_store %arg10[%c0_57, %c0_58, %c0_59], %132 {strides = array<i32>} : memref<1x16x256xf32, #tpu.memory_space<vmem>>, vector<1x16x256xf32>,
    return
  }
  func.func @transform_0(%arg0: i32) -> (i32, i32, i32) {
    %c0_i32 = arith.constant 0 : i32
    %c0_i32_0 = arith.constant 0 : i32
    %c0_i32_1 = arith.constant 0 : i32
    return %arg0, %c0_i32, %c0_i32_0 : i32, i32, i32
  }
  func.func @transform_1(%arg0: i32) -> (i32, i32) {
    %c0_i32 = arith.constant 0 : i32
    %c0_i32_0 = arith.constant 0 : i32
    %c0_i32_1 = arith.constant 0 : i32
    return %c0_i32, %c0_i32_0 : i32, i32
  }
  func.func @transform_2(%arg0: i32) -> (i32, i32) {
    %c0_i32 = arith.constant 0 : i32
    %c0_i32_0 = arith.constant 0 : i32
    %c0_i32_1 = arith.constant 0 : i32
    return %c0_i32, %c0_i32_0 : i32, i32
  }
  func.func @transform_3(%arg0: i32) -> (i32, i32) {
    %c0_i32 = arith.constant 0 : i32
    %c0_i32_0 = arith.constant 0 : i32
    %c0_i32_1 = arith.constant 0 : i32
    return %c0_i32, %c0_i32_0 : i32, i32
  }
  func.func @transform_4(%arg0: i32) -> (i32, i32) {
    %c0_i32 = arith.constant 0 : i32
    %c0_i32_0 = arith.constant 0 : i32
    %c0_i32_1 = arith.constant 0 : i32
    return %c0_i32, %c0_i32_0 : i32, i32
  }
  func.func @transform_5(%arg0: i32) -> (i32, i32) {
    %c0_i32 = arith.constant 0 : i32
    %c0_i32_0 = arith.constant 0 : i32
    %c0_i32_1 = arith.constant 0 : i32
    return %c0_i32, %c0_i32_0 : i32, i32
  }
  func.func @transform_6(%arg0: i32) -> (i32, i32) {
    %c0_i32 = arith.constant 0 : i32
    %c0_i32_0 = arith.constant 0 : i32
    %c0_i32_1 = arith.constant 0 : i32
    return %c0_i32, %c0_i32_0 : i32, i32
  }
  func.func @transform_7(%arg0: i32) -> (i32, i32) {
    %c0_i32 = arith.constant 0 : i32
    %c0_i32_0 = arith.constant 0 : i32
    %c0_i32_1 = arith.constant 0 : i32
    return %c0_i32, %c0_i32_0 : i32, i32
  }
  func.func @transform_8(%arg0: i32) -> (i32, i32) {
    %c0_i32 = arith.constant 0 : i32
    %c0_i32_0 = arith.constant 0 : i32
    %c0_i32_1 = arith.constant 0 : i32
    return %c0_i32, %c0_i32_0 : i32, i32
  }
  func.func @transform_9(%arg0: i32) -> (i32, i32, i32) {
    %c0_i32 = arith.constant 0 : i32
    %c0_i32_0 = arith.constant 0 : i32
    %c0_i32_1 = arith.constant 0 : i32
    return %arg0, %c0_i32, %c0_i32_0 : i32, i32, i32
  }
}

</mosaic_0001>

<bundles_post_ra>
// kernel: ds_conv_pallas.1
= control target key start
LH: loop header
LB: loop body
LE: loop exit
PB: predicated region body
PF: predicated region fallthrough
CT: control target
= control target key end

     0   :  { %s1368_s30 = smov 0   ;;  %s1721_s0 = inlined_call_operand.vmem [shape: f32[2,16,512], index: 0, kind: input, shape index: {}]   ;;  %s1722_s1 = inlined_call_operand.vmem [shape: f32[16,9], index: 1, kind: input, shape index: {}]   ;;  %s1723_s2 = inlined_call_operand.vmem [shape: f32[16,1], index: 2, kind: input, shape index: {}]   ;;  %s1724_s3 = inlined_call_operand.vmem [shape: f32[16,8], index: 3, kind: input, shape index: {}]   ;;  %s1725_s4 = inlined_call_operand.vmem [shape: f32[1,8], index: 4, kind: input, shape index: {}]   ;;  %s1726_s5 = inlined_call_operand.vmem [shape: f32[16,8], index: 5, kind: input, shape index: {}]   ;;  %s1727_s6 = inlined_call_operand.vmem [shape: f32[16,1], index: 6, kind: input, shape index: {}]   ;;  %s1728_s7 = inlined_call_operand.vmem [shape: f32[16,16], index: 7, kind: input, shape index: {}]   ;;  %s1729_s8 = inlined_call_operand.vmem [shape: f32[16,1], index: 8, kind: input, shape index: {}]   ;;  %s1730_s9 = inlined_call_operand.vmem [shape: f32[2,16,256], index: 9, kind: output, shape index: {}]  }
   0x1 LB: > { %s1175_s10 = sadd.s32 4294967295, %s1301_s30   ;;  %p1179_p0 = scmp.ge.s32.totalorder %s1301_s30, 1  ;;  %s1301_s30 = sphi %s1368_s30, %s19_s30  }
   0x2   : > { %p287_p1 = scmp.lt.s32.totalorder %s1301_s30, 3 }
   0x4   : > { %p288_p2 = pnand %p1179_p0, %p287_p1 }
   0x5   : > { %v1379_v0 = vld [vmem:[%s1722_s1] sm:$0xff] (!%p288_p2)  ;;  %v1303_v1 = vmov (!%p288_p2), 3   ;;  %v1304_v2 = vmov (!%p288_p2), 6   ;;  %v1386_v3 = vld [vmem:[%s1722_s1 + $0x8] sm:$0xff] (!%p288_p2)  ;;  %v1305_v4 = vmov (!%p288_p2), 5   ;;  %v1306_v5 = vmov (!%p288_p2), 8  }
   0x6   : > { %291 = sbr.rel (%p288_p2) target bundleno = 1546 (0x60a), region = 56  ;;  %1228 = vset.pattern.permute.xlu0 (!%p288_p2), %v1303_v1  ;;  %1229 = vset.pattern.permute.xlu1 (!%p288_p2), %v1304_v2  ;;  %v1307_v6 = vmov (!%p288_p2), 0   ;;  %v1308_v7 = vmov (!%p288_p2), 2   ;;  %v1309_v8 = vmov (!%p288_p2), 4   ;;  %p323_p3 = scmp.lt.s32.totalorder (!%p288_p2), %s1175_s10, 1  ;;  %v1312_v49 = vmov (!%p288_p2), 7  }
   0x7   : > { %466 = vperm.xlu0 (!%p288_p2), %1228, %v1379_v0   ;;  %514 = vperm.xlu1 (!%p288_p2), %1229, %v1379_v0   ;;  %s1310_s19 = smov (!%p288_p2), 112   ;;  %s1311_s20 = smov (!%p288_p2), 96   ;;  %v1313_v50 = vmov (!%p288_p2), 1   ;;  %vm434_vm0 = vcmask (!%p288_p2), 785408   ;;  %vm381_vm1 = vcmask (!%p288_p2), 916480   ;;  %vm722_vm2 = vcmask (!%p288_p2), 138240  }
   0x8   : > { %s1314_s21 = smov (!%p288_p2), 17   ;;  %s1315_s22 = smov (!%p288_p2), 15   ;;  %vm785_vm5 = vcmask (!%p288_p2), 121856   ;;  %vm902_vm8 = vcmask (!%p288_p2), 130048   ;;  %vm924_vm9 = vcmask (!%p288_p2), 64512  }
   0x9   : > { %s1316_s27 = smov (!%p288_p2), 16  }
   0xb   : > { %470 = vperm.xlu0 (!%p288_p2), %1228, %v1386_v3   ;;  %518 = vperm.xlu1 (!%p288_p2), %1229, %v1386_v3  }
   0xd   : > { %s1738_s10 = smov (!%p323_p3, %s1175_s10), 1 }
   0xe   : > { %s1197_s15 = sshll.u32 %s1738_s10, 6  ;;  %s1198_s12 = sshll.u32 %s1738_s10, 5 }
   0xf   : > { %1230 = vset.pattern.permute.xlu0 %v1305_v4  ;;  %1231 = vset.pattern.permute.xlu1 %v1305_v4  ;;  %s1409_s18 = scalar_lea.vmem %s1721_s0, %s1197_s15  ;;  %s332_s15 = scalar_lea.vmem %s1730_s9, %s1198_s12 }
  0x10   : > { %576 = vperm.xlu0 %1230, %v1379_v0   ;;  %580 = vperm.xlu1 %1231, %v1386_v3   ;;  %v1412_v9 = vld [vmem:[%s1409_s18] sm:$0xff]  ;;  %v1415_v10 = vld [vmem:[%s1409_s18 + $0x8] sm:$0xff]  ;;  %v1420_v14 = vld [vmem:[%s1409_s18 + $0x10] sm:$0xff] }
  0x11   : > { %v1423_v15 = vld [vmem:[%s1409_s18 + $0x20] sm:$0xff]  ;;  %v1430_v19 = vld [vmem:[%s1409_s18 + $0x28] sm:$0xff]  ;;  %v1433_v20 = vld [vmem:[%s1409_s18 + $0x30] sm:$0xff] }
  0x12   : > { %v1444_v26 = vld [vmem:[%s1409_s18 + $0x18] sm:$0xff] }
  0x13   : > { %v1451_v30 = vld [vmem:[%s1409_s18 + $0x38] sm:$0xff] }
  0x14   : > { %1232 = vset.pattern.permute.xlu1 %v1306_v5  ;;  %1233 = vset.pattern.permute.xlu0 %v1306_v5 }
  0x15   : > { %624 = vperm.xlu1 %1232, %v1379_v0   ;;  %628 = vperm.xlu0 %1233, %v1386_v3  }
  0x19   : > { %1234 = vset.pattern.permute.xlu1 %v1307_v6  ;;  %1235 = vset.pattern.permute.xlu0 %v1308_v7 }
  0x1a   : > { %452 = vperm.xlu1 %1234, %v1379_v0   ;;  %562 = vperm.xlu0 %1235, %v1379_v0  }
  0x1e   : > { %456 = vperm.xlu1 %1234, %v1386_v3   ;;  %1238 = vset.pattern.permute.xlu0 %v1309_v8 }
  0x22   : > { %1236 = vset.pattern.permute.xlu1 %v1308_v7 }
  0x23   : > { %566 = vperm.xlu1 %1236, %v1386_v3  }
  0x27   : > { %1237 = vset.pattern.permute.xlu1 %v1309_v8 }
  0x86   : > { %v467_v11 = vpop.permute.xlu0 %466  ;;  %v515_v21 = vpop.permute.xlu1 %514 }
  0x87   : > { %v473_v12 = vmul.f32 %v467_v11, %v1412_v9  ;;  %v474_v13 = vmul.f32 %v467_v11, %v1415_v10  ;;  %v475_v17 = vmul.f32 %v467_v11, %v1420_v14  ;;  %v521_v24 = vmul.f32 %v515_v21, %v1415_v10 }
  0x88   : > { %v522_v25 = vmul.f32 %v515_v21, %v1420_v14  ;;  %v523_v28 = vmul.f32 %v515_v21, %v1444_v26 }
  0x89   : > { %487 = vrot.lane.b32.xlu0 %v474_v13, %s1310_s19  ;;  %485 = vrot.lane.b32.xlu1 %v473_v12, %s1310_s19 }
  0x8a   : > { %v471_v16 = vpop.permute.xlu0 %470  ;;  %v519_v27 = vpop.permute.xlu1 %518 }
  0x8b   : > { %v476_v18 = vmul.f32 %v471_v16, %v1423_v15  ;;  %v477_v22 = vmul.f32 %v471_v16, %v1430_v19  ;;  %v478_v23 = vmul.f32 %v471_v16, %v1433_v20  ;;  %v524_v29 = vmul.f32 %v519_v27, %v1430_v19 }
  0x8c   : > { %v525_v32 = vmul.f32 %v519_v27, %v1433_v20  ;;  %v526_v33 = vmul.f32 %v519_v27, %v1451_v30 }
  0x8d   : > { %491 = vrot.lane.b32.xlu0 %v476_v18, %s1310_s19  ;;  %489 = vrot.lane.b32.xlu1 %v475_v17, %s1310_s19 }
  0x8f   : > { %v577_v31 = vpop.permute.xlu0 %576  ;;  %v581_v36 = vpop.permute.xlu1 %580 }
  0x90   : > { %v583_v34 = vmul.f32 %v577_v31, %v1415_v10  ;;  %v584_v35 = vmul.f32 %v577_v31, %v1420_v14  ;;  %v586_v37 = vmul.f32 %v581_v36, %v1430_v19  ;;  %v585_v38 = vmul.f32 %v577_v31, %v1444_v26 }
  0x91   : > { %495 = vrot.lane.b32.xlu0 %v478_v23, %s1310_s19  ;;  %493 = vrot.lane.b32.xlu1 %v477_v22, %s1310_s19  ;;  %v587_v40 = vmul.f32 %v581_v36, %v1433_v20  ;;  %v588_v41 = vmul.f32 %v581_v36, %v1451_v30 }
  0x94   : > { %v625_v39 = vpop.permute.xlu1 %624  ;;  %v629_v44 = vpop.permute.xlu0 %628 }
  0x95   : > { %535 = vrot.lane.b32.xlu0 %v522_v25, %s1311_s20  ;;  %533 = vrot.lane.b32.xlu1 %v521_v24, %s1311_s20  ;;  %v631_v42 = vmul.f32 %v625_v39, %v1415_v10  ;;  %v632_v43 = vmul.f32 %v625_v39, %v1420_v14  ;;  %v634_v45 = vmul.f32 %v629_v44, %v1430_v19 }
  0x96   : > { %v633_v46 = vmul.f32 %v625_v39, %v1444_v26  ;;  %v635_v47 = vmul.f32 %v629_v44, %v1433_v20  ;;  %v636_v48 = vmul.f32 %v629_v44, %v1451_v30 }
  0x99   : > { %539 = vrot.lane.b32.xlu0 %v524_v29, %s1311_s20  ;;  %537 = vrot.lane.b32.xlu1 %v523_v28, %s1311_s20  ;;  %v453_v51 = vpop.permute.xlu1 %452  ;;  %v1491_v54 = vpop.permute.xlu0 %562 }
  0x9a   : > { %v461_v63 = vmul.f32 %v453_v51, %v1420_v14  ;;  %v569_v27 = vmul.f32 %v1491_v54, %v1412_v9 }
  0x9d   : > { %543 = vrot.lane.b32.xlu0 %v526_v33, %s1311_s20  ;;  %541 = vrot.lane.b32.xlu1 %v525_v32, %s1311_s20  ;;  %v1487_v52 = vpop.permute.xlu1 %456  ;;  %v459_v33 = vmul.f32 %v453_v51, %v1412_v9 }
  0x9e   : > { %v464_v7 = vmul.f32 %v1487_v52, %v1433_v20 }
  0xa1   : > { %597 = vrot.lane.b32.xlu0 %v584_v35, %s1310_s19  ;;  %595 = vrot.lane.b32.xlu1 %v583_v34, %s1310_s19 }
  0xa2   : > { %v1489_v53 = vpop.permute.xlu1 %566 }
  0xa3   : > { %v572_v34 = vmul.f32 %v1489_v53, %v1423_v15 }
  0xa5   : > { %601 = vrot.lane.b32.xlu0 %v586_v37, %s1310_s19  ;;  %599 = vrot.lane.b32.xlu1 %v585_v38, %s1310_s19 }
  0xa9   : > { %605 = vrot.lane.b32.xlu0 %v588_v41, %s1310_s19  ;;  %603 = vrot.lane.b32.xlu1 %v587_v40, %s1310_s19  ;;  %v460_v41 = vmul.f32 %v453_v51, %v1415_v10 }
  0xad   : > { %645 = vrot.lane.b32.xlu0 %v632_v43, %s1311_s20  ;;  %643 = vrot.lane.b32.xlu1 %v631_v42, %s1311_s20  ;;  %v463_v42 = vmul.f32 %v1487_v52, %v1430_v19 }
  0xb1   : > { %649 = vrot.lane.b32.xlu0 %v634_v45, %s1311_s20  ;;  %647 = vrot.lane.b32.xlu1 %v633_v46, %s1311_s20 }
  0xb5   : > { %653 = vrot.lane.b32.xlu0 %v636_v48, %s1311_s20  ;;  %651 = vrot.lane.b32.xlu1 %v635_v47, %s1311_s20 }
  0xb9   : > { %358 = vperm.xlu1 %1237, %v1379_v0   ;;  %362 = vperm.xlu0 %1238, %v1386_v3  }
  0xbd   : > { %1239 = vset.pattern.permute.xlu1 %v1312_v49  ;;  %1240 = vset.pattern.permute.xlu0 %v1313_v50 }
  0xbe   : > { %403 = vperm.xlu1 %1239, %v1379_v0  }
  0xc2   : > { %407 = vperm.xlu1 %1239, %v1386_v3  }
  0xc6   : > { %1241 = vset.pattern.permute.xlu1 %v1313_v50 }
  0xfb   : > { %v488_v55 = vpop.permute.xlu0 %487  ;;  %v486_v56 = vpop.permute.xlu1 %485 }
  0xfc   : > { %v497_v29 = vsel %vm381_vm1, %v486_v56, %v488_v55  ;;  %v571_v56 = vmul.f32 %v1491_v54, %v1420_v14 }
  0xfd   : > { %v507_v36 = vadd.f32 %v497_v29, %v459_v33 }
  0xff   : > { %v492_v57 = vpop.permute.xlu0 %491  ;;  %v490_v58 = vpop.permute.xlu1 %489 }
 0x100   : > { %v509_v1 = vadd.f32 %v490_v58, %v461_v63  ;;  %v498_v38 = vsel %vm381_vm1, %v488_v55, %v490_v58  ;;  %v462_v55 = vmul.f32 %v1487_v52, %v1423_v15  ;;  %v573_v52 = vmul.f32 %v1489_v53, %v1430_v19 }
 0x101   : > { %v508_v48 = vadd.f32 %v498_v38, %v460_v41 }
 0x103   : > { %v496_v59 = vpop.permute.xlu0 %495  ;;  %v494_v60 = vpop.permute.xlu1 %493 }
 0x104   : > { %v512_v11 = vadd.f32 %v496_v59, %v464_v7  ;;  %v500_v39 = vsel %vm381_vm1, %v494_v60, %v496_v59  ;;  %v499_v50 = vsel %vm381_vm1, %v492_v57, %v494_v60 }
 0x105   : > { %v511_v49 = vadd.f32 %v500_v39, %v463_v42 }
 0x107   : > { %v536_v61 = vpop.permute.xlu0 %535  ;;  %v534_v62 = vpop.permute.xlu1 %533 }
 0x108   : > { %v555_v43 = vadd.f32 %v534_v62, %v507_v36  ;;  %v545_v46 = vsel %vm434_vm0, %v534_v62, %v536_v61  ;;  %v510_v62 = vadd.f32 %v499_v50, %v462_v55 }
 0x109   : > { %v556_v58 = vadd.f32 %v545_v46, %v508_v48 }
 0x10b   : > { %v540_v2 = vpop.permute.xlu0 %539  ;;  %v538_v4 = vpop.permute.xlu1 %537 }
 0x10c   : > { %v546_v5 = vsel %vm434_vm0, %v536_v61, %v538_v4  ;;  %v570_v4 = vmul.f32 %v1491_v54, %v1415_v10 }
 0x10d   : > { %v557_v8 = vadd.f32 %v546_v5, %v509_v1  ;;  %v558_v5 = vadd.f32 %v540_v2, %v510_v62 }
 0x10f   : > { %v544_v12 = vpop.permute.xlu0 %543  ;;  %714 = vrot.lane.b32.xlu0 %v557_v8, %s1314_s21  ;;  %v542_v13 = vpop.permute.xlu1 %541 }
 0x110   : > { %v548_v16 = vsel %vm434_vm0, %v542_v13, %v544_v12  ;;  %v547_v47 = vsel %vm434_vm0, %v540_v2, %v542_v13 }
 0x111   : > { %v560_v17 = vadd.f32 %v548_v16, %v512_v11  ;;  %v559_v59 = vadd.f32 %v547_v47, %v511_v49 }
 0x113   : > { %v598_v18 = vpop.permute.xlu0 %597  ;;  %720 = vrot.lane.b32.xlu1 %v560_v17, %s1314_s21  ;;  %v596_v21 = vpop.permute.xlu1 %595 }
 0x114   : > { %v617_v28 = vadd.f32 %v596_v21, %v569_v27  ;;  %v607_v57 = vsel %vm381_vm1, %v596_v21, %v598_v18 }
 0x115   : > { %v618_v12 = vadd.f32 %v607_v57, %v570_v4 }
 0x117   : > { %v602_v22 = vpop.permute.xlu0 %601  ;;  %v600_v23 = vpop.permute.xlu1 %599 }
 0x118   : > { %v620_v37 = vadd.f32 %v602_v22, %v572_v34  ;;  %v608_v51 = vsel %vm381_vm1, %v598_v18, %v600_v23  ;;  %v574_v18 = vmul.f32 %v1489_v53, %v1433_v20 }
 0x119   : > { %v619_v63 = vadd.f32 %v608_v51, %v571_v56 }
 0x11b   : > { %v606_v24 = vpop.permute.xlu0 %605  ;;  %v604_v25 = vpop.permute.xlu1 %603 }
 0x11c   : > { %v609_v60 = vsel %vm381_vm1, %v602_v22, %v604_v25  ;;  %v610_v17 = vsel %vm381_vm1, %v604_v25, %v606_v24 }
 0x11d   : > { %v621_v13 = vadd.f32 %v609_v60, %v573_v52  ;;  %v622_v22 = vadd.f32 %v610_v17, %v574_v18 }
 0x11f   : > { %v646_v31 = vpop.permute.xlu0 %645  ;;  %v644_v32 = vpop.permute.xlu1 %643 }
 0x120   : > { %v665_v35 = vadd.f32 %v644_v32, %v617_v28  ;;  %v655_v8 = vsel %vm434_vm0, %v644_v32, %v646_v31 }
 0x121   : > { %v666_v21 = vadd.f32 %v655_v8, %v618_v12 }
 0x122   : > { %773 = vrot.lane.b32.xlu0 %v665_v35, %s1315_s22 }
 0x123   : > { %v650_v40 = vpop.permute.xlu0 %649  ;;  %v648_v45 = vpop.permute.xlu1 %647 }
 0x124   : > { %v668_v44 = vadd.f32 %v650_v40, %v620_v37  ;;  %v656_v61 = vsel %vm434_vm0, %v646_v31, %v648_v45 }
 0x125   : > { %v667_v7 = vadd.f32 %v656_v61, %v619_v63 }
 0x126   : > { %779 = vrot.lane.b32.xlu1 %v668_v44, %s1315_s22  ;;  %710 = vrot.lane.b32.xlu0 %v555_v43, %s1314_s21 }
 0x127   : > { %v652_v1 = vpop.permute.xlu1 %651  ;;  %v654_v16 = vpop.permute.xlu0 %653 }
 0x128   : > { %v657_v11 = vsel %vm434_vm0, %v650_v40, %v652_v1  ;;  %v658_v2 = vsel %vm434_vm0, %v652_v1, %v654_v16 }
 0x129   : > { %v669_v54 = vadd.f32 %v657_v11, %v621_v13  ;;  %v670_v23 = vadd.f32 %v658_v2, %v622_v22 }
 0x12a   : > { %712 = vrot.lane.b32.xlu1 %v556_v58, %s1314_s21  ;;  %718 = vrot.lane.b32.xlu0 %v559_v59, %s1314_s21 }
 0x12e   : > { %716 = vrot.lane.b32.xlu1 %v558_v5, %s1314_s21  ;;  %777 = vrot.lane.b32.xlu0 %v667_v7, %s1315_s22 }
 0x132   : > { %775 = vrot.lane.b32.xlu1 %v666_v21, %s1315_s22  ;;  %781 = vrot.lane.b32.xlu0 %v669_v54, %s1315_s22 }
 0x136   : > { %783 = vrot.lane.b32.xlu1 %v670_v23, %s1315_s22  ;;  %343 = vperm.xlu0 %1240, %v1379_v0  }
 0x138   : > { %v359_v27 = vpop.permute.xlu1 %358  ;;  %v363_v28 = vpop.permute.xlu0 %362 }
 0x139   : > { %v366_v24 = vmul.f32 %v359_v27, %v1420_v14  ;;  %v365_v53 = vmul.f32 %v359_v27, %v1415_v10  ;;  %v368_v25 = vmul.f32 %v363_v28, %v1433_v20  ;;  %v367_v31 = vmul.f32 %v363_v28, %v1430_v19 }
 0x13a   : > { %348 = vperm.xlu1 %1241, %v1386_v3   ;;  %1243 = vset.pattern.permute.xlu0 %v1307_v6 }
 0x13b   : > { %375 = vrot.lane.b32.xlu0 %v366_v24, %s1310_s19 }
 0x13d   : > { %v404_v29 = vpop.permute.xlu1 %403 }
 0x13e   : > { %373 = vrot.lane.b32.xlu1 %v365_v53, %s1310_s19  ;;  %v411_v0 = vmul.f32 %v404_v29, %v1420_v14  ;;  %v410_v32 = vmul.f32 %v404_v29, %v1415_v10  ;;  %v412_v34 = vmul.f32 %v404_v29, %v1444_v26  ;;  %v824_v26 = vld [vmem:[%s1723_s2] sm:$0xff] }
 0x13f   : > { %379 = vrot.lane.b32.xlu0 %v368_v25, %s1310_s19  ;;  %1242 = vset.pattern.permute.xlu1 %v1307_v6  ;;  %v825_v6 = vld [vmem:[%s1723_s2 + $0x8] sm:$0xff] }
 0x141   : > { %v408_v3 = vpop.permute.xlu1 %407 }
 0x142   : > { %377 = vrot.lane.b32.xlu1 %v367_v31, %s1310_s19  ;;  %v413_v33 = vmul.f32 %v408_v3, %v1430_v19  ;;  %v415_v35 = vmul.f32 %v408_v3, %v1451_v30  ;;  %v414_v36 = vmul.f32 %v408_v3, %v1433_v20  ;;  %v671_v30 = vlaneseq }
 0x143   : > { %424 = vrot.lane.b32.xlu0 %v411_v0, %s1311_s20 }
 0x144   : > { %v672_v38 = vand.u32 127, %v671_v30 }
 0x146   : > { %422 = vrot.lane.b32.xlu1 %v410_v32, %s1311_s20  ;;  %v678_v41 = vand.u32 15, %v672_v38  ;;  %v673_v42 = vadd.s32 128, %v672_v38 }
 0x147   : > { %428 = vrot.lane.b32.xlu0 %v413_v33, %s1311_s20 }
 0x148   : > { %vm1573_vm3 = vcmp.ne.s32.totalorder %v678_v41, 0  ;;  %v685_v46 = vand.u32 15, %v673_v42  ;;  %vm1594_vm6 = vcmp.ne.s32.totalorder %v678_v41, 15 }
 0x14a   : > { %426 = vrot.lane.b32.xlu1 %v412_v34, %s1311_s20  ;;  %vm1582_vm4 = vcmp.ne.s32.totalorder %v685_v46, 0  ;;  %vm762_vm7 = vcmp.ne.s32.totalorder %v685_v46, 15 }
 0x14b   : > { %432 = vrot.lane.b32.xlu0 %v415_v35, %s1311_s20 }
 0x14e   : > { %430 = vrot.lane.b32.xlu1 %v414_v36, %s1311_s20 }
 0x14f   : > { %833 = vperm.xlu0 %1243, %v825_v6  }
 0x152   : > { %828 = vperm.xlu1 %1242, %v824_v26  }
 0x181   : > { %v715_v37 = vpop.permute.xlu0 %714 }
 0x185   : > { %v721_v39 = vpop.permute.xlu1 %720 }
 0x194   : > { %v774_v40 = vpop.permute.xlu0 %773 }
 0x198   : > { %v780_v43 = vpop.permute.xlu1 %779  ;;  %v711_v44 = vpop.permute.xlu0 %710 }
 0x19c   : > { %v713_v47 = vpop.permute.xlu1 %712  ;;  %v719_v48 = vpop.permute.xlu0 %718 }
 0x19d   : > { %v723_v49 = vsel %vm722_vm2, %v711_v44, %v713_v47  ;;  %v724_v51 = vsel %vm722_vm2, %v713_v47, %v715_v37  ;;  %v726_v63 = vsel %vm722_vm2, %v719_v48, %v721_v39 }
 0x19e   : > { %v731_v50 = vsel %vm1573_vm3, %v723_v49, 0.0  ;;  %v732_v61 = vsel %vm1582_vm4, %v724_v51, 0.0  ;;  %v734_v4 = vsel %vm1582_vm4, %v726_v63, 0.0 }
 0x19f   : > { %739 = vrot.lane.b32.xlu1 %v731_v50, %s1310_s19 }
 0x1a0   : > { %v717_v56 = vpop.permute.xlu1 %716  ;;  %v778_v58 = vpop.permute.xlu0 %777 }
 0x1a1   : > { %v725_v59 = vsel %vm722_vm2, %v717_v56, %v719_v48 }
 0x1a2   : > { %v733_v62 = vsel %vm1573_vm3, %v725_v59, 0.0 }
 0x1a3   : > { %741 = vrot.lane.b32.xlu1 %v732_v61, %s1310_s19  ;;  %743 = vrot.lane.b32.xlu0 %v733_v62, %s1310_s19 }
 0x1a4   : > { %v776_v57 = vpop.permute.xlu1 %775  ;;  %v782_v60 = vpop.permute.xlu0 %781 }
 0x1a5   : > { %v786_v52 = vsel %vm785_vm5, %v774_v40, %v776_v57  ;;  %v787_v7 = vsel %vm785_vm5, %v776_v57, %v778_v58  ;;  %v788_v8 = vsel %vm785_vm5, %v780_v43, %v782_v60 }
 0x1a6   : > { %v794_v5 = vsel %vm1594_vm6, %v786_v52, 0.0  ;;  %v795_v12 = vsel %vm762_vm7, %v787_v7, 0.0  ;;  %v796_v13 = vsel %vm1594_vm6, %v788_v8, 0.0 }
 0x1a7   : > { %745 = vrot.lane.b32.xlu1 %v734_v4, %s1310_s19  ;;  %802 = vrot.lane.b32.xlu0 %v794_v5, %s1310_s19 }
 0x1a8   : > { %v784_v11 = vpop.permute.xlu1 %783 }
 0x1a9   : > { %v789_v16 = vsel %vm785_vm5, %v782_v60, %v784_v11 }
 0x1aa   : > { %v797_v17 = vsel %vm762_vm7, %v789_v16, 0.0 }
 0x1ab   : > { %804 = vrot.lane.b32.xlu1 %v795_v12, %s1310_s19  ;;  %806 = vrot.lane.b32.xlu0 %v796_v13, %s1310_s19 }
 0x1af   : > { %808 = vrot.lane.b32.xlu1 %v797_v17, %s1310_s19 }
 0x1b5   : > { %v344_v21 = vpop.permute.xlu0 %343 }
 0x1b6   : > { %v351_v0 = vmul.f32 %v344_v21, %v1412_v9  ;;  %v353_v34 = vmul.f32 %v344_v21, %v1420_v14  ;;  %v352_v36 = vmul.f32 %v344_v21, %v1415_v10 }
 0x1b9   : > { %v349_v18 = vpop.permute.xlu1 %348  ;;  %v376_v2 = vpop.permute.xlu0 %375 }
 0x1ba   : > { %v354_v32 = vmul.f32 %v349_v18, %v1423_v15  ;;  %v356_v26 = vmul.f32 %v349_v18, %v1433_v20  ;;  %v392_v40 = vadd.f32 %v376_v2, %v353_v34  ;;  %v355_v9 = vmul.f32 %v349_v18, %v1430_v19 }
 0x1bd   : > { %v374_v54 = vpop.permute.xlu1 %373  ;;  %v380_v23 = vpop.permute.xlu0 %379 }
 0x1be   : > { %v390_v35 = vadd.f32 %v374_v54, %v351_v0  ;;  %v382_v6 = vsel %vm381_vm1, %v374_v54, %v376_v2  ;;  %v395_v46 = vadd.f32 %v380_v23, %v356_v26 }
 0x1bf   : > { %v391_v42 = vadd.f32 %v382_v6, %v352_v36 }
 0x1c1   : > { %v378_v22 = vpop.permute.xlu1 %377  ;;  %v425_v28 = vpop.permute.xlu0 %424 }
 0x1c2   : > { %v393_v37 = vadd.f32 %v378_v22, %v354_v32  ;;  %v383_v43 = vsel %vm381_vm1, %v378_v22, %v380_v23 }
 0x1c3   : > { %v394_v58 = vadd.f32 %v383_v43, %v355_v9 }
 0x1c5   : > { %v423_v27 = vpop.permute.xlu1 %422  ;;  %v429_v53 = vpop.permute.xlu0 %428 }
 0x1c6   : > { %v445_v41 = vadd.f32 %v423_v27, %v390_v35  ;;  %v435_v44 = vsel %vm434_vm0, %v423_v27, %v425_v28  ;;  %v448_v47 = vadd.f32 %v429_v53, %v393_v37 }
 0x1c7   : > { %v446_v59 = vadd.f32 %v435_v44, %v391_v42 }
 0x1c9   : > { %v427_v24 = vpop.permute.xlu1 %426  ;;  %v433_v29 = vpop.permute.xlu0 %432 }
 0x1ca   : > { %v436_v15 = vsel %vm434_vm0, %v425_v28, %v427_v24 }
 0x1cb   : > { %v447_v50 = vadd.f32 %v436_v15, %v392_v40 }
 0x1cd   : > { %v431_v25 = vpop.permute.xlu1 %430 }
 0x1ce   : > { %v834_v3 = vpop.permute.xlu0 %833  ;;  %v438_v51 = vsel %vm434_vm0, %v431_v25, %v433_v29  ;;  %v437_v61 = vsel %vm434_vm0, %v429_v53, %v431_v25 }
 0x1cf   : > { %v450_v57 = vadd.f32 %v438_v51, %v395_v46  ;;  %v449_v13 = vadd.f32 %v437_v61, %v394_v58 }
 0x1d1   : > { %v829_v31 = vpop.permute.xlu1 %828 }
 0x211   : > { %v740_v33 = vpop.permute.xlu1 %739 }
 0x212   : > { %v755_v45 = vadd.f32 %v740_v33, %v445_v41 }
 0x215   : > { %v742_v38 = vpop.permute.xlu1 %741  ;;  %v744_v39 = vpop.permute.xlu0 %743 }
 0x216   : > { %v747_v55 = vsel %vm381_vm1, %v740_v33, %v742_v38  ;;  %v757_v62 = vadd.f32 %v742_v38, %v447_v50  ;;  %v758_v63 = vadd.f32 %v744_v39, %v448_v47 }
 0x217   : > { %v756_v60 = vadd.f32 %v747_v55, %v446_v59 }
 0x219   : > { %v746_v48 = vpop.permute.xlu1 %745  ;;  %v803_v49 = vpop.permute.xlu0 %802 }
 0x21a   : > { %v818_v56 = vadd.f32 %v803_v49, %v755_v45  ;;  %v748_v52 = vsel %vm381_vm1, %v744_v39, %v746_v48  ;;  %v760_v17 = vadd.f32 %v746_v48, %v450_v57 }
 0x21b   : > { %v759_v54 = vadd.f32 %v748_v52, %v449_v13 }
 0x21c   : > { %v836_v1 = vadd.f32 %v829_v31, %v818_v56 }
 0x21d   : > { %v805_v4 = vpop.permute.xlu1 %804  ;;  %v807_v5 = vpop.permute.xlu0 %806 }
 0x21e   : > { %v1184_v7 = vmul.f32 -1.442695, %v836_v1  ;;  %v810_v8 = vsel %vm381_vm1, %v803_v49, %v805_v4  ;;  %v820_v11 = vadd.f32 %v805_v4, %v757_v62  ;;  %v821_v12 = vadd.f32 %v807_v5, %v758_v63 }
 0x21f   : > { %v819_v16 = vadd.f32 %v810_v8, %v756_v60  ;;  %v920_v8 = vld [vmem:[%s1724_s3] sm:$0xff] }
 0x220   : > { %1259 = vpow2.f32 %v1184_v7  ;;  %v838_v18 = vadd.f32 %v829_v31, %v820_v11  ;;  %v839_v21 = vadd.f32 %v834_v3, %v821_v12  ;;  %v921_v11 = vld [vmem:[%s1724_s3 + $0x8] sm:$0xff] }
 0x221   : > { %v837_v2 = vadd.f32 %v829_v31, %v819_v16  ;;  %v809_v22 = vpop.permute.xlu1 %808 }
 0x222   : > { %v1186_v23 = vmul.f32 -1.442695, %v838_v18  ;;  %v1187_v27 = vmul.f32 -1.442695, %v839_v21  ;;  %v811_v28 = vsel %vm381_vm1, %v807_v5, %v809_v22  ;;  %v823_v24 = vadd.f32 %v809_v22, %v760_v17 }
 0x223   : > { %v1185_v53 = vmul.f32 -1.442695, %v837_v2  ;;  %v822_v25 = vadd.f32 %v811_v28, %v759_v54 }
 0x224   : > { %1261 = vpow2.f32 %v1186_v23  ;;  %v841_v29 = vadd.f32 %v834_v3, %v823_v24  ;;  %v934_v24 = vld [vmem:[%s1725_s4] sm:$0x1] }
 0x225   : > { %1263 = vpow2.f32 %v1185_v53  ;;  %v840_v0 = vadd.f32 %v834_v3, %v822_v25 }
 0x226   : > { %1265 = vpow2.f32 %v1187_v27  ;;  %v1189_v32 = vmul.f32 -1.442695, %v841_v29 }
 0x227   : > { %v1188_v33 = vmul.f32 -1.442695, %v840_v0 }
 0x228   : > { %1267 = vpow2.f32 %v1189_v32 }
 0x229   : > { %1269 = vpow2.f32 %v1188_v33  ;;  %v946_v33 = vshrl.u32 %v671_v30, 7  ;;  %v957_v30 = vld [vmem:[%s1727_s6] sm:$0xff] }
 0x22a   : > { %v1260_v34 = vpop.eup %1259 }
 0x22b   : > { %v860_v35 = vadd.f32 1.0, %v1260_v34  ;;  %v947_v34 = vsub.s32 0, %v946_v33 }
 0x22d   : > { %1271 = vrcp.f32 %v860_v35 }
 0x22e   : > { %v1262_v31 = vpop.eup %1261 }
 0x22f   : > { %v1264_v36 = vpop.eup %1263  ;;  %v862_v6 = vadd.f32 1.0, %v1262_v31 }
 0x230   : > { %v1266_v26 = vpop.eup %1265  ;;  %v861_v37 = vadd.f32 1.0, %v1264_v36  ;;  %v943_v36 = vld [vmem:[%s1726_s5] sm:$0xff] }
 0x231   : > { %1273 = vrcp.f32 %v862_v6  ;;  %v863_v38 = vadd.f32 1.0, %v1266_v26  ;;  %v944_v26 = vld [vmem:[%s1726_s5 + $0x8] sm:$0xff] }
 0x232   : > { %v1268_v39 = vpop.eup %1267 }
 0x233   : > { %v1270_v40 = vpop.eup %1269  ;;  %1275 = vrcp.f32 %v863_v38  ;;  %v865_v3 = vadd.f32 1.0, %v1268_v39 }
 0x234   : > { %v864_v41 = vadd.f32 1.0, %v1270_v40  ;;  %1277 = vrcp.f32 %v861_v37 }
 0x236   : > { %1279 = vrcp.f32 %v864_v41 }
 0x237   : > { %v1272_v9 = vpop.eup %1271  ;;  %1281 = vrcp.f32 %v865_v3 }
 0x238   : > { %v1629_v42 = vmul.f32 %v1272_v9, %v836_v1  ;;  %v958_v9 = vld [vmem:[%s1727_s6 + $0x8] sm:$0xff] }
 0x23a   : > { %890 = vrot.lane.b32.xlu0 %v1629_v42, %s1316_s27 }
 0x23b   : > { %v1274_v15 = vpop.eup %1273 }
 0x23c   : > { %v1633_v43 = vmul.f32 %v1274_v15, %v838_v18 }
 0x23d   : > { %v1276_v44 = vpop.eup %1275 }
 0x23e   : > { %894 = vrot.lane.b32.xlu0 %v1633_v43, %s1316_s27  ;;  %v1637_v45 = vmul.f32 %v1276_v44, %v839_v21  ;;  %v1278_v46 = vpop.eup %1277 }
 0x23f   : > { %v1643_v49 = vmul.f32 %v1278_v46, %v837_v2 }
 0x240   : > { %v1280_v47 = vpop.eup %1279  ;;  %896 = vrot.lane.b32.xlu1 %v1637_v45, %s1316_s27 }
 0x241   : > { %v1641_v48 = vmul.f32 %v1280_v47, %v840_v0  ;;  %v1282_v50 = vpop.eup %1281 }
 0x242   : > { %v1649_v51 = vmul.f32 %v1282_v50, %v841_v29 }
 0x243   : > { %898 = vrot.lane.b32.xlu0 %v1641_v48, %s1316_s27 }
 0x244   : > { %892 = vrot.lane.b32.xlu1 %v1643_v49, %s1316_s27 }
 0x248   : > { %900 = vrot.lane.b32.xlu1 %v1649_v51, %s1316_s27 }
 0x2ac   : > { %v891_v55 = vpop.permute.xlu0 %890 }
 0x2b0   : > { %v895_v58 = vpop.permute.xlu0 %894 }
 0x2b2   : > { %v897_v56 = vpop.permute.xlu1 %896 }
 0x2b5   : > { %v899_v63 = vpop.permute.xlu0 %898 }
 0x2b6   : > { %v893_v59 = vpop.permute.xlu1 %892  ;;  %v905_v60 = vsel %vm902_vm8, %v897_v56, %v899_v63 }
 0x2b7   : > { %v903_v61 = vsel %vm902_vm8, %v891_v55, %v893_v59  ;;  %v904_v62 = vsel %vm902_vm8, %v893_v59, %v895_v58 }
 0x2b8   : > { %v911_v1 = vadd.f32 %v904_v62, %v903_v61 }
 0x2ba   : > { %v901_v57 = vpop.permute.xlu1 %900  ;;  %912 = vadd.xlane.f32.xlu0 %v911_v1 }
 0x2bb   : > { %v906_v52 = vsel %vm902_vm8, %v899_v63, %v901_v57 }
 0x2bc   : > { %v914_v4 = vadd.f32 %v906_v52, %v905_v60  ;;  %v1317_v60 = vmov 0.0  }
 0x2bd   : > { %1099 = vmatprep.mubr.f32.mxu0 %v1317_v60  ;;  %1105 = vmatprep.mubr.f32.mxu1 %v1317_v60 }
 0x2be   : > { %915 = vadd.xlane.f32.xlu1 %v914_v4 }
 0x347   : > { %v913_v5 = vpop.xlane.xlu0 %912 }
 0x348   : > { %v918_v7 = vmul.f32 0.00390625, %v913_v5 }
 0x34a   : > { %v922_v13 = vmul.f32 %v920_v8, %v918_v7 }
 0x34b   : > { %v916_v12 = vpop.xlane.xlu1 %915 }
 0x34c   : > { %v919_v16 = vmul.f32 0.00390625, %v916_v12  ;;  %v925_v18 = vsel %vm924_vm9, %v922_v13, 0.0 }
 0x34e   : > { %v923_v17 = vmul.f32 %v921_v11, %v919_v16 }
 0x350   : > { %v926_v21 = vsel %vm924_vm9, %v923_v17, 0.0 }
 0x351   : > { %v927_v54 = vadd.f32 %v926_v21, %v925_v18 }
 0x353   : > { %v928_v2 = vrot.slane %v927_v54, 4 }
 0x355   : > { %v929_v22 = vadd.f32 %v928_v2, %v927_v54 }
 0x357   : > { %v930_v23 = vrot.slane %v929_v22, 2 }
 0x359   : > { %v931_v27 = vadd.f32 %v930_v23, %v929_v22 }
 0x35b   : > { %v932_v28 = vrot.slane %v931_v27, 1 }
 0x35d   : > { %v933_v53 = vadd.f32 %v932_v28, %v931_v27 }
 0x35f   : > { %v935_v25 = vadd.f32 %v934_v24, %v933_v53  ;;  %v989_v24 = vld [vmem:[%s1728_s7] sm:$0xff]  ;;  %v990_v53 = vld [vmem:[%s1728_s7 + $0x8] sm:$0xff] }
 0x361   : > { %v1190_v29 = vmul.f32 -1.442695, %v935_v25 }
 0x363   : > { %1283 = vpow2.f32 %v1190_v29 }
 0x36d   : > { %v1284_v0 = vpop.eup %1283 }
 0x36e   : > { %v939_v32 = vadd.f32 1.0, %v1284_v0 }
 0x370   : > { %1285 = vrcp.f32 %v939_v32 }
 0x37a   : > { %v1286_v35 = vpop.eup %1285 }
 0x37b   : > { %v942_v31 = vmul.f32 %v1286_v35, %v935_v25 }
 0x37d   : > { %v948_v6 = vrot.slane %v942_v31, %v947_v34 }
 0x37f   : > { %v949_v37 = vmul.f32 %v948_v6, %v943_v36  ;;  %v950_v39 = vmul.f32 %v948_v6, %v944_v26 }
 0x381   : > { %v951_v38 = vsel %vm924_vm9, %v949_v37, 0.0  ;;  %v954_v40 = vsel %vm924_vm9, %v950_v39, 0.0 }
 0x382   : > { %952 = vadd.xlane.f32.xlu0 %v951_v38 }
 0x386   : > { %955 = vadd.xlane.f32.xlu0 %v954_v40 }
 0x40f   : > { %v953_v41 = vpop.xlane.xlu0 %952 }
 0x410   : > { %v959_v3 = vadd.f32 %v957_v30, %v953_v41 }
 0x412   : > { %v1191_v15 = vmul.f32 -1.442695, %v959_v3 }
 0x413   : > { %v956_v44 = vpop.xlane.xlu0 %955 }
 0x414   : > { %1287 = vpow2.f32 %v1191_v15  ;;  %v960_v46 = vadd.f32 %v958_v9, %v956_v44 }
 0x416   : > { %v1192_v47 = vmul.f32 -1.442695, %v960_v46 }
 0x418   : > { %1289 = vpow2.f32 %v1192_v47 }
 0x41e   : > { %v1288_v50 = vpop.eup %1287 }
 0x41f   : > { %v967_v55 = vadd.f32 1.0, %v1288_v50 }
 0x421   : > { %1291 = vrcp.f32 %v967_v55 }
 0x422   : > { %v1290_v56 = vpop.eup %1289 }
 0x423   : > { %v968_v58 = vadd.f32 1.0, %v1290_v56 }
 0x425   : > { %1293 = vrcp.f32 %v968_v58 }
 0x42b   : > { %v1292_v59 = vpop.eup %1291 }
 0x42c   : > { %975 = vperm.xlu1 %1242, %v1292_v59  }
 0x42f   : > { %v1294_v61 = vpop.eup %1293 }
 0x430   : > { %980 = vperm.xlu0 %1243, %v1294_v61  }
 0x4ab   : > { %v976_v62 = vpop.permute.xlu1 %975 }
 0x4ac   : > { %v984_v63 = vmul.f32 %v976_v62, %v1643_v49  ;;  %v985_v1 = vmul.f32 %v976_v62, %v1633_v43  ;;  %v983_v4 = vmul.f32 %v976_v62, %v1629_v42  ;;  %v991_v43 = vld [vmem:[%s1729_s8] sm:$0xff]  ;;  %v992_v42 = vld [vmem:[%s1729_s8 + $0x8] sm:$0xff] }
 0x4ae   : > { %v1244_v57 = vpack.i.bf16 %v985_v1, %v984_v63 }
 0x4af   : > { %v981_v52 = vpop.permute.xlu0 %980 }
 0x4b0   : > { %v986_v5 = vmul.f32 %v981_v52, %v1637_v45  ;;  %v987_v7 = vmul.f32 %v981_v52, %v1641_v48  ;;  %v988_v8 = vmul.f32 %v981_v52, %v1649_v51  ;;  %1245 = vrot.lane.b32.xlu1 %v1244_v57, %s1316_s27 }
 0x4b2   : > { %v1249_v11 = vpack.i.bf16 %v988_v8, %v987_v7  ;;  %v1254_v12 = vpack.i.bf16 %v986_v5, %v983_v4 }
 0x4b4   : > { %1250 = vrot.lane.b32.xlu1 %v1249_v11, %s1316_s27  ;;  %1255 = vrot.lane.b32.xlu0 %v1254_v12, %s1316_s27 }
 0x4b8   : > { %995 = vperm.xlu1 %1242, %v991_v43   ;;  %1000 = vperm.xlu0 %1243, %v992_v42  }
 0x522   : > { %v1246_v45 = vpop.permute.xlu1 %1245 }
 0x523   : > { %v1248_v48 = vunpack.i.h.bf16 %v1246_v45  ;;  %v1247_v49 = vunpack.i.l.bf16 %v1246_v45 }
 0x525   : > { %v1022_v54 = vsel %vm902_vm8, %v1247_v49, %v1248_v48 }
 0x526   : > { %v1251_v51 = vpop.permute.xlu1 %1250  ;;  %v1256_v13 = vpop.permute.xlu0 %1255 }
 0x527   : > { %v1253_v16 = vunpack.i.h.bf16 %v1251_v51  ;;  %v1252_v17 = vunpack.i.l.bf16 %v1251_v51  ;;  %v1258_v18 = vunpack.i.h.bf16 %v1256_v13  ;;  %v1257_v21 = vunpack.i.l.bf16 %v1256_v13 }
 0x529   : > { %v1024_v2 = vsel %vm902_vm8, %v1252_v17, %v1253_v16  ;;  %v1021_v22 = vsel %vm902_vm8, %v1257_v21, %v1247_v49  ;;  %v1023_v23 = vsel %vm902_vm8, %v1258_v18, %v1252_v17 }
 0x52a   : > { %v1199_v27 = vpack.c.bf16 %v1024_v2, %v1022_v54  ;;  %v1201_v28 = vpack.c.bf16 %v1023_v23, %v1021_v22 }
 0x52c   : > { %1200 = vmatprep.subr.bf16.mxu0 %v1199_v27  ;;  %1203 = vmatprep.subr.bf16.mxu1 %v1199_v27 }
 0x52d   : > { %1202 = vmatpush1.bf16.msra.mxu0 %v1201_v28  ;;  %1204 = vmatpush1.bf16.msra.mxu1 %v1201_v28 }
 0x530   : > { %1193 = vmatmul.mubr.msk.f32.vlgmr.msra.gmra.mrb[0].mxu0 %vm902_vm8, %v989_v24  ;;  %1194 = vmatmul.mubr.msk.f32.vlgmr.msra.gmra.mrb[0].mxu1 %vm902_vm8, %v990_v53 }
 0x537   : > { %v996_v25 = vpop.permute.xlu1 %995  ;;  %v1001_v29 = vpop.permute.xlu0 %1000 }
 0x603   : > { %v1101_v0 = vpop.f32.mrb[0].mxu0  ;;  %v1107_v32 = vpop.f32.mrb[0].mxu1 }
 0x604   : > { %v1102_v33 = vadd.f32 %v1101_v0, %v996_v25  ;;  %v1108_v34 = vadd.f32 %v1107_v32, %v1001_v29  ;;  %v1103_v35 = vpop.f32.mrb[1].mxu0  ;;  %v1109_v31 = vpop.f32.mrb[1].mxu1 }
 0x605   : > { %v1104_v36 = vadd.f32 %v1103_v35, %v996_v25  ;;  %v1110_v6 = vadd.f32 %v1109_v31, %v1001_v29 }
 0x606   : > { %v1112_v26 = vadd.f32 %v1102_v33, %v1415_v10  ;;  %v1114_v37 = vadd.f32 %v1108_v34, %v1430_v19 }
 0x607   : > { %v1113_v38 = vadd.f32 %v1104_v36, %v1420_v14  ;;  %v1115_v39 = vadd.f32 %v1110_v6, %v1433_v20 }
 0x608   : > { %1116 = vst [vmem:[%s332_s15] sm:$0xff] %v1112_v26  ;;  %1118 = vst [vmem:[%s332_s15 + $0x10] sm:$0xff] %v1114_v37 }
 0x609   : > { %1117 = vst [vmem:[%s332_s15 + $0x8] sm:$0xff] %v1113_v38  ;;  %1119 = vst [vmem:[%s332_s15 + $0x18] sm:$0xff] %v1115_v39 }
 0x60a PF: > { %s19_s30 = sadd.s32 1, %s1301_s30  }
 0x60b   : > { %p16_p4 = scmp.ge.s32.totalorder %s19_s30, 4  }
 0x60d   :  { %18 = sbr.rel (!%p16_p4) target bundleno = 1 (0x1), region = 86 }

</bundles_post_ra>
